<compile_context>
chip_gen: v5e
topology: v5e:2x2
jax: 0.10.0
libtpu: 0.0.40
codegen_flags: <defaults>
</compile_context>

<pallas_src>
import functools

import jax
import jax.numpy as jnp
from jax import lax
from jax.experimental import pallas as pl
from jax.experimental.pallas import tpu as pltpu


_EPS = 1e-07
_LANES = 128
_PER_BUFFER_BYTES = 8 << 20           # ~8 MiB per pipeline buffer (x + target)
_MAX_TILE_ROWS = 4096                 # bound lane-padded (tr, 1) temporaries
_VMEM_LIMIT_BYTES = 32 * 1024 * 1024  # 2 buffers * <=8 MiB stays well inside


def _round_up(a, b):
    return -(-a // b) * b


def _choose_tile_rows(n_rows, n_cols, itemsize):
    """Row tile sized from the *real* VMEM footprint per pipeline buffer."""
    padded_c = _round_up(max(n_cols, _LANES), _LANES)
    # Bytes per row in one buffer: lane-padded x row + (tr,1) int32 target row
    # (which also pads to a full 128-lane row in VMEM).
    per_row_bytes = padded_c * itemsize + _LANES * 4
    tr = _PER_BUFFER_BYTES // per_row_bytes
    tr = max(8, (tr // 8) * 8)
    tr = min(tr, _MAX_TILE_ROWS)
    if tr >= n_rows:
        return int(n_rows)            # single full-extent block
    return int(tr)


def _logitnorm_loss_kernel(x_ref, tgt_ref, out_ref, *, t, n_rows, tile_rows,
                           use_const_shift, mask_remainder):
    i = pl.program_id(0)

    x = x_ref[...].astype(jnp.float32)                         # (tr, C)
    tgt = tgt_ref[...]                                         # (tr, 1) int32

    # L2 norm over the class axis (+ eps after sqrt, matching torch.norm+1e-7).
    sumsq = jnp.sum(x * x, axis=-1, keepdims=True)             # (tr, 1)
    norms = jnp.sqrt(sumsq) + _EPS
    # EUP approx reciprocal + one Newton step -> ~exact 1/norm at negligible cost.
    inv = pl.reciprocal(norms, approx=True)
    inv = inv * (jnp.float32(2.0) - norms * inv)
    z = x * (inv * jnp.float32(1.0 / t))                       # |z| <= 1/t

    # Stable log-sum-exp. For reasonable t use the compile-time constant shift
    # (normalized logits are bounded by 1/t) and skip one XLU max per row.
    if use_const_shift:
        m = jnp.float32(1.0 / t)
    else:
        m = jnp.max(z, axis=-1, keepdims=True)
    lse = m + jnp.log(jnp.sum(jnp.exp(z - m), axis=-1, keepdims=True))  # (tr,1)

    # z[row, target[row]] via masked sum (no cross-lane gather, no onehot mul).
    col_ids = lax.broadcasted_iota(jnp.int32, z.shape, 1)      # (tr, C)
    picked = jnp.sum(jnp.where(col_ids == tgt, z, 0.0),
                     axis=-1, keepdims=True)                   # (tr, 1)

    per_row = lse - picked
    if mask_remainder:
        # Only compiled in when N % tile_rows != 0: padded rows of the last
        # block read unspecified data; per-row reductions keep any Inf/NaN
        # confined to those rows, which this mask zeroes out.
        row_ids = i * tile_rows + lax.broadcasted_iota(
            jnp.int32, (tile_rows, 1), 0)
        per_row = jnp.where(row_ids < n_rows, per_row, 0.0)

    out_ref[...] = jnp.sum(per_row, axis=(0, 1), keepdims=True)  # per-block sum


def logitnorm_loss(x, target, t=1.0, *, tile_rows=None):
    """LogitNormLoss forward: mean cross-entropy of (x / (||x||_2 + 1e-7)) / t.

    x: (N, C) float32 or bfloat16 logits (no wrapper cast; kernel computes in f32).
    target: (N,) integer class indices.
    """
    N, C = x.shape
    itemsize = jnp.dtype(x.dtype).itemsize
    if tile_rows is None:
        tile_rows = _choose_tile_rows(N, C, itemsize)
    tile_rows = int(tile_rows)

    nb = -(-N // tile_rows)                      # number of row blocks
    mask_remainder = (N % tile_rows) != 0 and tile_rows != N

    tgt2d = target.astype(jnp.int32).reshape(N, 1)

    kernel = functools.partial(
        _logitnorm_loss_kernel,
        t=float(t),
        n_rows=N,
        tile_rows=tile_rows,
        use_const_shift=(float(t) >= 0.05),  # exp(-2/t) stays normal in f32
        mask_remainder=mask_remainder,
    )

    partials = pl.pallas_call(
        kernel,
        out_shape=jax.ShapeDtypeStruct((nb, 1), jnp.float32),
        grid_spec=pltpu.PrefetchScalarGridSpec(
            num_scalar_prefetch=0,
            grid=(nb,),
            in_specs=[
                pl.BlockSpec((tile_rows, C), lambda i: (i, 0)),
                pl.BlockSpec((tile_rows, 1), lambda i: (i, 0)),
            ],
            out_specs=pl.BlockSpec((1, 1), lambda i: (i, 0)),
        ),
        compiler_params=pltpu.CompilerParams(
            dimension_semantics=("parallel",),
            vmem_limit_bytes=_VMEM_LIMIT_BYTES,
        ),
        cost_estimate=pl.CostEstimate(
            flops=6 * N * C,
            transcendentals=N * C + 2 * N,
            bytes_accessed=N * C * itemsize + N * 4 + nb * 4,
        ),
    )(x, tgt2d)

    return jnp.sum(partials) / jnp.float32(N)


def _reference(x, target, t=1.0):
    # pure-JAX reference mirroring the PyTorch module
    xf = x.astype(jnp.float32)
    norms = jnp.linalg.norm(xf, axis=-1, keepdims=True) + 1e-07
    z = xf / norms / t
    logp = jax.nn.log_softmax(z, axis=-1)
    nll = -jnp.take_along_axis(logp, target[:, None], axis=-1)[:, 0]
    return jnp.mean(nll)


if __name__ == "__main__":
    key = jax.random.PRNGKey(0)
    kx, kt = jax.random.split(key)

    # 1) Small batch, default tiling (single full-extent block).
    N, C = 50, 32
    x = jax.random.normal(kx, (N, C), dtype=jnp.float32)
    target = jax.random.randint(kt, (N,), 0, C, dtype=jnp.int32)
    loss = jax.block_until_ready(logitnorm_loss(x, target, t=1.0))
    ref = _reference(x, target, t=1.0)
    assert jnp.allclose(loss, ref, atol=1e-4, rtol=1e-4), (loss, ref)

    # 2) Even split into multiple blocks, different temperature.
    kx2, kt2 = jax.random.split(kt)
    N2, C2 = 64, 40
    x2 = jax.random.normal(kx2, (N2, C2), dtype=jnp.float32)
    tgt2 = jax.random.randint(kt2, (N2,), 0, C2, dtype=jnp.int32)
    loss2 = jax.block_until_ready(logitnorm_loss(x2, tgt2, t=0.5, tile_rows=16))
    ref2 = _reference(x2, tgt2, t=0.5)
    assert jnp.allclose(loss2, ref2, atol=1e-4, rtol=1e-4), (loss2, ref2)

    # 3) Remainder-mask path: N not a multiple of tile_rows.
    loss3 = jax.block_until_ready(logitnorm_loss(x, target, t=1.0, tile_rows=16))
    assert jnp.allclose(loss3, ref, atol=1e-4, rtol=1e-4), (loss3, ref)

    # 4) bf16 logits streamed from HBM, f32 compute in-kernel.
    xb = x.astype(jnp.bfloat16)
    loss4 = jax.block_until_ready(logitnorm_loss(xb, target, t=1.0))
    ref4 = _reference(xb, target, t=1.0)
    assert jnp.allclose(loss4, ref4, atol=1e-3, rtol=1e-3), (loss4, ref4)

    print("KERNEL_OK")
</pallas_src>

<mosaic_0001>
module attributes {stable_mosaic.version = 11 : i64} {
  func.func @_logitnorm_loss_kernel(%arg0: i32, %arg1: memref<50x32xf32, #tpu.memory_space<vmem>>, %arg2: memref<50x1xi32, #tpu.memory_space<vmem>>, %arg3: memref<1x1xf32, #tpu.memory_space<vmem>>) attributes {dimension_semantics = [#tpu.dimension_semantics<parallel>], iteration_bounds = array<i64: 1>, scalar_prefetch = 0 : i64, scratch_operands = 0 : i64, tpu.core_type = #tpu.core_type<tc>, window_params = [{transform_indices = @transform_0, window_bounds = array<i64: 50, 32>}, {transform_indices = @transform_1, window_bounds = array<i64: 50, 1>}, {transform_indices = @transform_2, window_bounds = array<i64: 1, 1>}]} {
    %c0 = arith.constant 0 : index
    %c0_0 = arith.constant 0 : index
    %0 = vector.load %arg1[%c0, %c0_0] : memref<50x32xf32, #tpu.memory_space<vmem>>, vector<50x32xf32>
    %c0_1 = arith.constant 0 : index
    %c0_2 = arith.constant 0 : index
    %1 = vector.load %arg2[%c0_1, %c0_2] : memref<50x1xi32, #tpu.memory_space<vmem>>, vector<50x1xi32>
    %2 = arith.mulf %0, %0 : vector<50x32xf32>
    %cst = arith.constant dense<0.000000e+00> : vector<50xf32>
    %3 = vector.multi_reduction <add>, %2, %cst [1] : vector<50x32xf32> to vector<50xf32>
    %4 = vector.shape_cast %3 : vector<50xf32> to vector<50x1xf32>
    %5 = math.sqrt %4 : vector<50x1xf32>
    %cst_3 = arith.constant 1.000000e-07 : f32
    %6 = vector.broadcast %cst_3 : f32 to vector<50x1xf32>
    %7 = arith.addf %5, %6 : vector<50x1xf32>
    %8 = tpu.reciprocal %7 {approx = true} : vector<50x1xf32> -> vector<50x1xf32>
    %9 = arith.mulf %7, %8 : vector<50x1xf32>
    %cst_4 = arith.constant 2.000000e+00 : f32
    %10 = vector.broadcast %cst_4 : f32 to vector<50x1xf32>
    %11 = arith.subf %10, %9 : vector<50x1xf32>
    %12 = arith.mulf %8, %11 : vector<50x1xf32>
    %cst_5 = arith.constant 1.000000e+00 : f32
    %13 = vector.broadcast %cst_5 : f32 to vector<50x1xf32>
    %14 = arith.mulf %12, %13 : vector<50x1xf32>
    %15 = vector.broadcast %14 : vector<50x1xf32> to vector<50x32xf32>
    %16 = arith.mulf %0, %15 : vector<50x32xf32>
    %cst_6 = arith.constant 1.000000e+00 : f32
    %17 = vector.broadcast %cst_6 : f32 to vector<50x32xf32>
    %18 = arith.subf %16, %17 : vector<50x32xf32>
    %19 = math.exp %18 : vector<50x32xf32>
    %cst_7 = arith.constant dense<0.000000e+00> : vector<50xf32>
    %20 = vector.multi_reduction <add>, %19, %cst_7 [1] : vector<50x32xf32> to vector<50xf32>
    %21 = vector.shape_cast %20 : vector<50xf32> to vector<50x1xf32>
    %22 = math.log %21 : vector<50x1xf32>
    %cst_8 = arith.constant 1.000000e+00 : f32
    %23 = vector.broadcast %cst_8 : f32 to vector<50x1xf32>
    %24 = arith.addf %23, %22 : vector<50x1xf32>
    %25 = tpu.iota {dimensions = array<i32: 1>} : vector<50x32xi32>
    %26 = vector.broadcast %1 : vector<50x1xi32> to vector<50x32xi32>
    %27 = arith.cmpi eq, %25, %26 : vector<50x32xi32>
    %cst_9 = arith.constant 0.000000e+00 : f32
    %28 = vector.broadcast %cst_9 : f32 to vector<50x32xf32>
    %29 = arith.select %27, %16, %28 : vector<50x32xi1>, vector<50x32xf32>
    %cst_10 = arith.constant dense<0.000000e+00> : vector<50xf32>
    %30 = vector.multi_reduction <add>, %29, %cst_10 [1] : vector<50x32xf32> to vector<50xf32>
    %31 = vector.shape_cast %30 : vector<50xf32> to vector<50x1xf32>
    %32 = arith.subf %24, %31 : vector<50x1xf32>
    %33 = vector.shape_cast %32 : vector<50x1xf32> to vector<1x50x1xf32>
    %cst_11 = arith.constant dense<0.000000e+00> : vector<1xf32>
    %34 = vector.multi_reduction <add>, %33, %cst_11 [1, 2] : vector<1x50x1xf32> to vector<1xf32>
    %35 = vector.shape_cast %34 : vector<1xf32> to vector<1x1x1xf32>
    %36 = vector.extract %35[0, 0, 0] : f32 from vector<1x1x1xf32>
    %37 = vector.broadcast %36 : f32 to vector<1x1xf32>
    %c0_12 = arith.constant 0 : index
    %c0_13 = arith.constant 0 : index
    %38 = vector.load %arg3[%c0_12, %c0_13] : memref<1x1xf32, #tpu.memory_space<vmem>>, vector<1x1xf32>
    tpu.vector_store %arg3[%c0_12, %c0_13], %37 {strides = array<i32>} : memref<1x1xf32, #tpu.memory_space<vmem>>, vector<1x1xf32>,
    return
  }
  func.func @transform_0(%arg0: i32) -> (i32, i32) {
    %c0_i32 = arith.constant 0 : i32
    %c0_i32_0 = arith.constant 0 : i32
    return %arg0, %c0_i32 : i32, i32
  }
  func.func @transform_1(%arg0: i32) -> (i32, i32) {
    %c0_i32 = arith.constant 0 : i32
    %c0_i32_0 = arith.constant 0 : i32
    return %arg0, %c0_i32 : i32, i32
  }
  func.func @transform_2(%arg0: i32) -> (i32, i32) {
    %c0_i32 = arith.constant 0 : i32
    %c0_i32_0 = arith.constant 0 : i32
    return %arg0, %c0_i32 : i32, i32
  }
}

</mosaic_0001>

<bundles_post_ra>
// kernel: tpu_custom_call.1
= control target key start
LH: loop header
LB: loop body
LE: loop exit
PB: predicated region body
PF: predicated region fallthrough
CT: control target
= control target key end

     0   :  { %vm33_vm0 = vcmask 261120   ;;  %v449_v6 = vmov 0   ;;  %s654_s0 = inlined_call_operand.vmem [shape: f32[50,32], index: 0, kind: input, shape index: {}]   ;;  %s655_s1 = inlined_call_operand.vmem [shape: s32[50,1], index: 1, kind: input, shape index: {}]   ;;  %s656_s2 = inlined_call_operand.hbm [shape: f32[1,1], index: 2, kind: output, shape index: {}]  }
   0x1   :  { %v469_v0 = vld [vmem:[%s654_s0 + $0x20] sm:$0xff]  ;;  %v474_v1 = vld [vmem:[%s654_s0 + $0x10] sm:$0xff]  ;;  %364 = vset.pattern.permute.xlu1 %v449_v6  ;;  %366 = vset.pattern.permute.xlu0 %v449_v6  ;;  %v490_v7 = vld [vmem:[%s654_s0 + $0x28] sm:$0xff] }
   0x2   :  { %v479_v2 = vld [vmem:[%s654_s0] sm:$0xff]  ;;  %v30_v3 = vmul.f32 %v469_v0, %v469_v0  ;;  %v28_v4 = vmul.f32 %v474_v1, %v474_v1  ;;  %v495_v8 = vld [vmem:[%s654_s0 + $0x18] sm:$0xff]  ;;  %365 = vset.pattern.permute.xlu2 %v449_v6 }
   0x3   :  { %v26_v5 = vmul.f32 %v479_v2, %v479_v2 }
   0x4   :  { %7 = vsyncpa [#allocation3], 0  ;;  %v46_v9 = vsel %vm33_vm0, %v30_v3, 0.0  ;;  %v40_v10 = vsel %vm33_vm0, %v28_v4, 0.0  ;;  %v503_v12 = vld [vmem:[%s654_s0 + $0x8] sm:$0xff]  ;;  %v31_v13 = vmul.f32 %v490_v7, %v490_v7  ;;  %v29_v14 = vmul.f32 %v495_v8, %v495_v8  ;;  %v19_v23 = vld [vmem:[%s655_s1] sm:$0xff] }
   0x5   :  { %v34_v11 = vsel %vm33_vm0, %v26_v5, 0.0  ;;  %47 = vadd.xlane.f32.xlu2 %v46_v9  ;;  %41 = vadd.xlane.f32.xlu1 %v40_v10  ;;  %v27_v15 = vmul.f32 %v503_v12, %v503_v12  ;;  %v517_v19 = vld [vmem:[%s654_s0 + $0x30] sm:$0x3]  ;;  %vm52_vm1 = vcmask 254976   ;;  %v20_v22 = vld [vmem:[%s655_s1 + $0x8] sm:$0xff]  ;;  %v22_v25 = vld [vmem:[%s655_s1 + $0x18] sm:$0xff] }
   0x6   :  { %35 = vadd.xlane.f32.xlu0 %v34_v11  ;;  %v49_v16 = vsel %vm33_vm0, %v31_v13, 0.0  ;;  %v43_v17 = vsel %vm33_vm0, %v29_v14, 0.0  ;;  %v32_v20 = vmul.f32 %v517_v19, %v517_v19  ;;  %v21_v24 = vld [vmem:[%s655_s1 + $0x10] sm:$0xff]  ;;  %v23_v26 = vld [vmem:[%s655_s1 + $0x20] sm:$0xff]  ;;  %v24_v27 = vld [vmem:[%s655_s1 + $0x28] sm:$0xff]  ;;  %s344_s9 = sshll.u32 %s656_s2, 4  ;;  %s345_s9 = int_to_ptr.hbm [resolvable:$true] %s344_s9 }
   0x7   :  { %v37_v18 = vsel %vm33_vm0, %v27_v15, 0.0  ;;  %v25_v28 = vld [vmem:[%s655_s1 + $0x30] sm:$0x3]  ;;  %v245_v15 = vlaneseq  ;;  %s450_s10 = smov [#allocation2]  }
   0x8   :  { %v53_v21 = vsel %vm52_vm1, %v32_v20, 0.0  ;;  %s342_s11 = sshll.u32 %s450_s10, 4  ;;  %s343_s11 = int_to_ptr.vmem [resolvable:$true] %s342_s11 }
   0xd   :  { %50 = vadd.xlane.f32.xlu2 %v49_v16  ;;  %44 = vadd.xlane.f32.xlu1 %v43_v17 }
   0xe   :  { %38 = vadd.xlane.f32.xlu0 %v37_v18 }
  0x16   :  { %54 = vadd.xlane.f32.xlu0 %v53_v21 }
  0x25   :  { %251 = vperm.xlu2 %365, %v20_v22  }
  0x26   :  { %248 = vperm.xlu1 %364, %v19_v23  }
  0x2a   :  { %254 = vperm.xlu0 %366, %v21_v24  }
  0x2d   :  { %257 = vperm.xlu2 %365, %v22_v25  }
  0x2e   :  { %260 = vperm.xlu1 %364, %v23_v26  }
  0x35   :  { %263 = vperm.xlu2 %365, %v24_v27  }
  0x36   :  { %266 = vperm.xlu1 %364, %v25_v28  }
  0x78   :  { %v543_v29 = vpop.xlane.xlu2 %47  ;;  %v42_v30 = vpop.xlane.xlu1 %41 }
  0x79   :  { %367 = vrsqrt.f32 %v543_v29  ;;  %v546_v31 = vpop.xlane.xlu0 %35  ;;  %vm111_vm2 = vcmp.eq.f32.partialorder %v543_v29, inf  ;;  %vm113_vm3 = vcmp.eq.f32.partialorder %v543_v29, 0.0  ;;  %v114_v49 = vand.u32 2147483648, %v543_v29 }
  0x7a   :  { %369 = vrsqrt.f32 %v42_v30  ;;  %vm87_vm4 = vcmp.eq.f32.partialorder %v42_v30, inf  ;;  %vm89_vm5 = vcmp.eq.f32.partialorder %v42_v30, 0.0  ;;  %v90_v56 = vand.u32 2147483648, %v42_v30 }
  0x7b   :  { %371 = vrsqrt.f32 %v546_v31  ;;  %vm63_vm6 = vcmp.eq.f32.partialorder %v546_v31, inf  ;;  %vm65_vm7 = vcmp.eq.f32.partialorder %v546_v31, 0.0  ;;  %v66_v10 = vand.u32 2147483648, %v546_v31 }
  0x7f   :  { %v368_v32 = vpop.eup %367 }
  0x80   :  { %v370_v33 = vpop.eup %369  ;;  %v105_v34 = vmul.f32 %v368_v32, %v543_v29  ;;  %v550_v35 = vpop.xlane.xlu2 %50 }
  0x81   :  { %v552_v36 = vpop.xlane.xlu1 %44  ;;  %v372_v37 = vpop.eup %371  ;;  %v81_v38 = vmul.f32 %v370_v33, %v42_v30  ;;  %373 = vrsqrt.f32 %v550_v35  ;;  %vm123_vm8 = vcmp.eq.f32.partialorder %v550_v35, inf  ;;  %vm125_vm9 = vcmp.eq.f32.partialorder %v550_v35, 0.0 }
  0x82   :  { %v555_v39 = vpop.xlane.xlu0 %38  ;;  %v106_v40 = vmul.f32 %v368_v32, %v105_v34  ;;  %v57_v41 = vmul.f32 %v372_v37, %v546_v31  ;;  %375 = vrsqrt.f32 %v552_v36  ;;  %vm99_vm10 = vcmp.eq.f32.partialorder %v552_v36, inf }
  0x83   :  { %v82_v42 = vmul.f32 %v370_v33, %v81_v38  ;;  %377 = vrsqrt.f32 %v555_v39  ;;  %vm101_vm11 = vcmp.eq.f32.partialorder %v552_v36, 0.0  ;;  %vm75_vm12 = vcmp.eq.f32.partialorder %v555_v39, inf }
  0x84   :  { %v107_v43 = vmul.f32 0.5, %v106_v40  ;;  %v58_v44 = vmul.f32 %v372_v37, %v57_v41  ;;  %v102_v41 = vand.u32 2147483648, %v552_v36  ;;  %vm77_vm13 = vcmp.eq.f32.partialorder %v555_v39, 0.0 }
  0x85   :  { %v83_v45 = vmul.f32 0.5, %v82_v42 }
  0x86   :  { %v108_v46 = vsub.f32 1.5, %v107_v43  ;;  %v59_v47 = vmul.f32 0.5, %v58_v44 }
  0x87   :  { %v374_v48 = vpop.eup %373  ;;  %v84_v50 = vsub.f32 1.5, %v83_v45 }
  0x88   :  { %v376_v51 = vpop.eup %375  ;;  %v109_v52 = vmul.f32 %v368_v32, %v108_v46  ;;  %v60_v53 = vsub.f32 1.5, %v59_v47  ;;  %v117_v54 = vmul.f32 %v374_v48, %v550_v35  ;;  %v78_v46 = vand.u32 2147483648, %v555_v39 }
  0x89   :  { %v85_v55 = vmul.f32 %v370_v33, %v84_v50  ;;  %v93_v57 = vmul.f32 %v376_v51, %v552_v36  ;;  %v378_v59 = vpop.eup %377 }
  0x8a   :  { %v565_v58 = vpop.xlane.xlu0 %54  ;;  %v110_v60 = vmul.f32 %v109_v52, %v543_v29  ;;  %v61_v61 = vmul.f32 %v372_v37, %v60_v53  ;;  %v118_v62 = vmul.f32 %v374_v48, %v117_v54  ;;  %v69_v4 = vmul.f32 %v378_v59, %v555_v39 }
  0x8b   :  { %379 = vrsqrt.f32 %v565_v58  ;;  %v86_v63 = vmul.f32 %v85_v55, %v42_v30  ;;  %v94_v3 = vmul.f32 %v376_v51, %v93_v57  ;;  %vm135_vm14 = vcmp.eq.f32.partialorder %v565_v58, inf }
  0x8c   :  { %v112_v5 = vsel %vm111_vm2, %v543_v29, %v110_v60  ;;  %v62_v6 = vmul.f32 %v61_v61, %v546_v31  ;;  %v119_v9 = vmul.f32 0.5, %v118_v62  ;;  %v70_v14 = vmul.f32 %v378_v59, %v69_v4 }
  0x8d   :  { %v88_v11 = vsel %vm87_vm4, %v42_v30, %v86_v63  ;;  %v95_v13 = vmul.f32 0.5, %v94_v3  ;;  %v115_v20 = vsel %vm113_vm3, %v114_v49, %v112_v5  ;;  %v126_v29 = vand.u32 2147483648, %v550_v35 }
  0x8e   :  { %v120_v16 = vsub.f32 1.5, %v119_v9  ;;  %v64_v17 = vsel %vm63_vm6, %v546_v31, %v62_v6  ;;  %v91_v18 = vsel %vm89_vm5, %v90_v56, %v88_v11  ;;  %v71_v22 = vmul.f32 0.5, %v70_v14 }
  0x8f   :  { %v96_v21 = vsub.f32 1.5, %v95_v13  ;;  %v67_v23 = vsel %vm65_vm7, %v66_v10, %v64_v17  ;;  %v142_v24 = vadd.f32 1e-07, %v91_v18  ;;  %v144_v28 = vadd.f32 1e-07, %v115_v20 }
  0x90   :  { %v121_v26 = vmul.f32 %v374_v48, %v120_v16  ;;  %v140_v27 = vadd.f32 1e-07, %v67_v23  ;;  %v72_v33 = vsub.f32 1.5, %v71_v22  ;;  %v602_v56 = vand.u32 127, %v245_v15 }
  0x91   :  { %v380_v25 = vpop.eup %379  ;;  %v97_v32 = vmul.f32 %v376_v51, %v96_v21  ;;  %vm137_vm15 = vcmp.eq.f32.partialorder %v565_v58, 0.0 }
  0x92   :  { %v129_v30 = vmul.f32 %v380_v25, %v565_v58  ;;  %v122_v31 = vmul.f32 %v121_v26, %v550_v35  ;;  %381 = vrcp.f32 %v140_v27  ;;  %v73_v37 = vmul.f32 %v378_v59, %v72_v33 }
  0x93   :  { %v98_v34 = vmul.f32 %v97_v32, %v552_v36  ;;  %383 = vrcp.f32 %v142_v24 }
  0x94   :  { %v130_v38 = vmul.f32 %v380_v25, %v129_v30  ;;  %v124_v40 = vsel %vm123_vm8, %v550_v35, %v122_v31  ;;  %385 = vrcp.f32 %v144_v28  ;;  %v74_v43 = vmul.f32 %v73_v37, %v555_v39 }
  0x95   :  { %v100_v42 = vsel %vm99_vm10, %v552_v36, %v98_v34  ;;  %v127_v45 = vsel %vm125_vm9, %v126_v29, %v124_v40  ;;  %vm335_vm9 = vcmask 0  }
  0x96   :  { %v131_v44 = vmul.f32 0.5, %v130_v38  ;;  %v103_v47 = vsel %vm101_vm11, %v102_v41, %v100_v42  ;;  %v145_v48 = vadd.f32 1e-07, %v127_v45  ;;  %v76_v49 = vsel %vm75_vm12, %v555_v39, %v74_v43 }
  0x97   :  { %v143_v51 = vadd.f32 1e-07, %v103_v47  ;;  %v79_v36 = vsel %vm77_vm13, %v78_v46, %v76_v49  ;;  %v138_v39 = vand.u32 2147483648, %v565_v58 }
  0x98   :  { %v132_v50 = vsub.f32 1.5, %v131_v44  ;;  %v382_v52 = vpop.eup %381  ;;  %387 = vrcp.f32 %v145_v48  ;;  %v141_v59 = vadd.f32 1e-07, %v79_v36  ;;  %v249_v3 = vpop.permute.xlu1 %248 }
  0x99   :  { %v384_v53 = vpop.eup %383  ;;  %v154_v55 = vmul.f32 %v382_v52, %v140_v27  ;;  %389 = vrcp.f32 %v143_v51  ;;  %vm268_vm2 = vcmp.eq.s32.totalorder %v602_v56, %v249_v3 }
  0x9a   :  { %v133_v54 = vmul.f32 %v380_v25, %v132_v50  ;;  %v386_v35 = vpop.eup %385  ;;  %v156_v57 = vmul.f32 %v384_v53, %v142_v24  ;;  %391 = vrcp.f32 %v141_v59  ;;  %v252_v50 = vpop.permute.xlu2 %251 }
  0x9b   :  { %v161_v61 = vsub.f32 2.0, %v154_v55  ;;  %v158_v5 = vmul.f32 %v386_v35, %v144_v28  ;;  %vm269_vm3 = vcmp.eq.s32.totalorder %v602_v56, %v252_v50 }
  0x9c   :  { %v134_v60 = vmul.f32 %v133_v54, %v565_v58  ;;  %v163_v62 = vsub.f32 2.0, %v156_v57 }
  0x9d   :  { %v168_v4 = vmul.f32 %v382_v52, %v161_v61 }
  0x9e   :  { %v136_v63 = vsel %vm135_vm14, %v565_v58, %v134_v60  ;;  %v388_v6 = vpop.eup %387  ;;  %v170_v9 = vmul.f32 %v384_v53, %v163_v62  ;;  %v165_v58 = vsub.f32 2.0, %v158_v5  ;;  %v255_v62 = vpop.permute.xlu0 %254 }
  0x9f   :  { %v139_v10 = vsel %vm137_vm15, %v138_v39, %v136_v63  ;;  %v175_v11 = vmul.f32 %v168_v4, %v479_v2  ;;  %v159_v13 = vmul.f32 %v388_v6, %v145_v48  ;;  %v390_v15 = vpop.eup %389  ;;  %vm270_vm4 = vcmp.eq.s32.totalorder %v602_v56, %v255_v62 }
  0xa0   :  { %v146_v14 = vadd.f32 1e-07, %v139_v10  ;;  %v612_v16 = vmul.f32 %v170_v9, %v474_v1  ;;  %v157_v20 = vmul.f32 %v390_v15, %v143_v51  ;;  %v392_v21 = vpop.eup %391  ;;  %v172_v33 = vmul.f32 %v386_v35, %v165_v58  ;;  %v261_v4 = vpop.permute.xlu1 %260 }
  0xa1   :  { %v275_v17 = vsel %vm268_vm2, %v175_v11, 0.0  ;;  %v353_v18 = vadd.f32 -1.0, %v175_v11  ;;  %v166_v24 = vsub.f32 2.0, %v159_v13  ;;  %v155_v2 = vmul.f32 %v392_v21, %v141_v59 }
  0xa2   :  { %v282_v22 = vsel %vm33_vm0, %v275_v17, 0.0  ;;  %v355_v23 = vadd.f32 -1.0, %v612_v16  ;;  %v164_v26 = vsub.f32 2.0, %v157_v20  ;;  %393 = vrcp.f32 %v146_v14  ;;  %v258_v60 = vpop.permute.xlu2 %257 }
  0xa3   :  { %283 = vadd.xlane.f32.xlu1 %v282_v22  ;;  %v189_v25 = vmul.f32 1.442695, %v353_v18  ;;  %v173_v28 = vmul.f32 %v388_v6, %v166_v24  ;;  %v162_v32 = vsub.f32 2.0, %v155_v2  ;;  %v179_v40 = vmul.f32 %v172_v33, %v469_v0 }
  0xa4   :  { %v193_v27 = vmul.f32 1.442695, %v355_v23  ;;  %v171_v1 = vmul.f32 %v390_v15, %v164_v26  ;;  %vm271_vm5 = vcmp.eq.s32.totalorder %v602_v56, %v258_v60  ;;  %v277_v6 = vsel %vm270_vm4, %v612_v16, 0.0 }
  0xa5   :  { %395 = vpow2.f32 %v189_v25  ;;  %v169_v31 = vmul.f32 %v392_v21, %v162_v32  ;;  %v618_v29 = vmul.f32 %v173_v28, %v490_v7  ;;  %v357_v49 = vadd.f32 -1.0, %v179_v40 }
  0xa6   :  { %397 = vpow2.f32 %v193_v27  ;;  %v178_v30 = vmul.f32 %v171_v1, %v495_v8  ;;  %v288_v13 = vsel %vm33_vm0, %v277_v6, 0.0  ;;  %vm272_vm6 = vcmp.eq.s32.totalorder %v602_v56, %v261_v4 }
  0xa7   :  { %v176_v38 = vmul.f32 %v169_v31, %v503_v12  ;;  %v358_v45 = vadd.f32 -1.0, %v618_v29  ;;  %v197_v52 = vmul.f32 1.442695, %v357_v49  ;;  %v279_v17 = vsel %vm272_vm6, %v179_v40, 0.0 }
  0xa8   :  { %v394_v34 = vpop.eup %393  ;;  %v356_v37 = vadd.f32 -1.0, %v178_v30  ;;  %v278_v9 = vsel %vm271_vm5, %v178_v30, 0.0  ;;  %v267_v15 = vpop.permute.xlu1 %266  ;;  %v294_v20 = vsel %vm33_vm0, %v279_v17, 0.0 }
  0xa9   :  { %v160_v41 = vmul.f32 %v394_v34, %v146_v14  ;;  %v354_v44 = vadd.f32 -1.0, %v176_v38  ;;  %v199_v0 = vmul.f32 1.442695, %v358_v45  ;;  %v276_v5 = vsel %vm269_vm3, %v176_v38, 0.0 }
  0xaa   :  { %v195_v43 = vmul.f32 1.442695, %v356_v37  ;;  %v264_v10 = vpop.permute.xlu2 %263  ;;  %v285_v11 = vsel %vm33_vm0, %v276_v5, 0.0  ;;  %v291_v14 = vsel %vm33_vm0, %v278_v9, 0.0  ;;  %vm274_vm8 = vcmp.eq.s32.totalorder %v602_v56, %v267_v15 }
  0xab   :  { %v396_v42 = vpop.eup %395  ;;  %v167_v8 = vsub.f32 2.0, %v160_v41  ;;  %v191_v7 = vmul.f32 1.442695, %v354_v44  ;;  %vm273_vm7 = vcmp.eq.s32.totalorder %v602_v56, %v264_v10 }
  0xac   :  { %v398_v46 = vpop.eup %397  ;;  %v203_v47 = vsel %vm33_vm0, %v396_v42, 0.0  ;;  %399 = vpow2.f32 %v195_v43  ;;  %v280_v16 = vsel %vm273_vm7, %v618_v29, 0.0 }
  0xad   :  { %v209_v48 = vsel %vm33_vm0, %v398_v46, 0.0  ;;  %204 = vadd.xlane.f32.xlu2 %v203_v47  ;;  %v174_v12 = vmul.f32 %v394_v34, %v167_v8  ;;  %401 = vpow2.f32 %v191_v7  ;;  %v297_v58 = vsel %vm33_vm0, %v280_v16, 0.0 }
  0xae   :  { %210 = vadd.xlane.f32.xlu0 %v209_v48  ;;  %403 = vpow2.f32 %v199_v0 }
  0xaf   :  { %v181_v51 = vmul.f32 %v174_v12, %v517_v19  ;;  %405 = vpow2.f32 %v197_v52 }
  0xb1   :  { %v359_v36 = vadd.f32 -1.0, %v181_v51  ;;  %v281_v18 = vsel %vm274_vm8, %v181_v51, 0.0 }
  0xb2   :  { %v400_v53 = vpop.eup %399  ;;  %v300_v21 = vsel %vm52_vm1, %v281_v18, 0.0 }
  0xb3   :  { %v212_v54 = vsel %vm33_vm0, %v400_v53, 0.0  ;;  %v201_v55 = vmul.f32 1.442695, %v359_v36  ;;  %v402_v35 = vpop.eup %401 }
  0xb4   :  { %v206_v57 = vsel %vm33_vm0, %v402_v35, 0.0  ;;  %v404_v59 = vpop.eup %403 }
  0xb5   :  { %213 = vadd.xlane.f32.xlu2 %v212_v54  ;;  %407 = vpow2.f32 %v201_v55  ;;  %207 = vadd.xlane.f32.xlu1 %v206_v57  ;;  %v406_v61 = vpop.eup %405  ;;  %v218_v19 = vsel %vm33_vm0, %v404_v59, 0.0 }
  0xb6   :  { %v215_v3 = vsel %vm33_vm0, %v406_v61, 0.0  ;;  %vm310_vm0 = vcmask 7168  }
  0xbb   :  { %v408_v39 = vpop.eup %407 }
  0xbc   :  { %v221_v63 = vsel %vm52_vm1, %v408_v39, 0.0  ;;  %vm322_vm1 = vcmask 1024  }
  0xbd   :  { %219 = vadd.xlane.f32.xlu2 %v218_v19  ;;  %222 = vadd.xlane.f32.xlu0 %v221_v63 }
  0xbe   :  { %216 = vadd.xlane.f32.xlu1 %v215_v3 }
  0xc5   :  { %286 = vadd.xlane.f32.xlu2 %v285_v11  ;;  %289 = vadd.xlane.f32.xlu0 %v288_v13 }
  0xc6   :  { %292 = vadd.xlane.f32.xlu1 %v291_v14 }
  0xcd   :  { %295 = vadd.xlane.f32.xlu2 %v294_v20  ;;  %298 = vadd.xlane.f32.xlu0 %v297_v58 }
  0xce   :  { %301 = vadd.xlane.f32.xlu1 %v300_v21 }
 0x116   :  { %v284_v23 = vpop.xlane.xlu1 %283 }
 0x120   :  { %v205_v22 = vpop.xlane.xlu2 %204 }
 0x121   :  { %409 = vlog2.f32 %v205_v22  ;;  %v211_v24 = vpop.xlane.xlu0 %210 }
 0x122   :  { %411 = vlog2.f32 %v211_v24 }
 0x127   :  { %v410_v56 = vpop.eup %409 }
 0x128   :  { %v214_v25 = vpop.xlane.xlu2 %213  ;;  %v208_v26 = vpop.xlane.xlu1 %207  ;;  %v225_v2 = vmul.f32 0.6931472, %v410_v56 }
 0x129   :  { %413 = vlog2.f32 %v208_v26  ;;  %v412_v27 = vpop.eup %411 }
 0x12a   :  { %415 = vlog2.f32 %v214_v25  ;;  %v238_v30 = vadd.f32 1.0, %v225_v2  ;;  %v229_v34 = vmul.f32 0.6931472, %v412_v27 }
 0x12c   :  { %v303_v37 = vsub.f32 %v238_v30, %v284_v23  ;;  %v240_v43 = vadd.f32 1.0, %v229_v34 }
 0x12e   :  { %v311_v49 = vsel %vm310_vm0, %v303_v37, 0.0 }
 0x12f   :  { %v414_v1 = vpop.eup %413 }
 0x130   :  { %v220_v28 = vpop.xlane.xlu2 %219  ;;  %v223_v32 = vpop.xlane.xlu0 %222  ;;  %v227_v31 = vmul.f32 0.6931472, %v414_v1 }
 0x131   :  { %417 = vlog2.f32 %v220_v28  ;;  %v217_v33 = vpop.xlane.xlu1 %216  ;;  %v416_v29 = vpop.eup %415 }
 0x132   :  { %419 = vlog2.f32 %v217_v33  ;;  %v231_v38 = vmul.f32 0.6931472, %v416_v29  ;;  %v239_v40 = vadd.f32 1.0, %v227_v31 }
 0x133   :  { %421 = vlog2.f32 %v223_v32 }
 0x134   :  { %v241_v0 = vadd.f32 1.0, %v231_v38 }
 0x137   :  { %v418_v41 = vpop.eup %417 }
 0x138   :  { %v287_v42 = vpop.xlane.xlu2 %286  ;;  %v420_v44 = vpop.eup %419  ;;  %v235_v50 = vmul.f32 0.6931472, %v418_v41 }
 0x139   :  { %v304_v45 = vsub.f32 %v239_v40, %v287_v42  ;;  %v290_v46 = vpop.xlane.xlu0 %289  ;;  %v422_v47 = vpop.eup %421  ;;  %v233_v7 = vmul.f32 0.6931472, %v420_v44 }
 0x13a   :  { %v293_v8 = vpop.xlane.xlu1 %292  ;;  %v305_v48 = vsub.f32 %v240_v43, %v290_v46  ;;  %v237_v52 = vmul.f32 0.6931472, %v422_v47  ;;  %v243_v57 = vadd.f32 1.0, %v235_v50 }
 0x13b   :  { %v312_v12 = vsel %vm310_vm0, %v304_v45, 0.0  ;;  %v306_v36 = vsub.f32 %v241_v0, %v293_v8  ;;  %v242_v55 = vadd.f32 1.0, %v233_v7 }
 0x13c   :  { %v313_v51 = vadd.f32 %v312_v12, %v311_v49  ;;  %v314_v53 = vsel %vm310_vm0, %v305_v48, 0.0  ;;  %v244_v61 = vadd.f32 1.0, %v237_v52 }
 0x13d   :  { %v316_v59 = vsel %vm310_vm0, %v306_v36, 0.0 }
 0x13e   :  { %v315_v54 = vadd.f32 %v314_v53, %v313_v51 }
 0x140   :  { %v296_v35 = vpop.xlane.xlu2 %295  ;;  %v317_v62 = vadd.f32 %v316_v59, %v315_v54 }
 0x141   :  { %v307_v60 = vsub.f32 %v242_v55, %v296_v35  ;;  %v299_v39 = vpop.xlane.xlu0 %298 }
 0x142   :  { %v302_v19 = vpop.xlane.xlu1 %301  ;;  %v308_v63 = vsub.f32 %v243_v57, %v299_v39 }
 0x143   :  { %v318_v3 = vsel %vm310_vm0, %v307_v60, 0.0  ;;  %v309_v4 = vsub.f32 %v244_v61, %v302_v19 }
 0x144   :  { %v319_v5 = vadd.f32 %v318_v3, %v317_v62  ;;  %v320_v6 = vsel %vm310_vm0, %v308_v63, 0.0 }
 0x145   :  { %v323_v10 = vsel %vm322_vm1, %v309_v4, 0.0 }
 0x146   :  { %v321_v9 = vadd.f32 %v320_v6, %v319_v5 }
 0x148   :  { %v324_v11 = vadd.f32 %v323_v10, %v321_v9 }
 0x14a   :  { %325 = vadd.xlane.f32.xlu2 %v324_v11 }
 0x1bd   :  { %v326_v13 = vpop.xlane.xlu2 %325 }
 0x1be   :  { %v327_v14 = vrot.slane %v326_v13, 4 }
 0x1c0   :  { %v328_v15 = vadd.f32 %v327_v14, %v326_v13 }
 0x1c2   :  { %v329_v17 = vrot.slane %v328_v15, 2 }
 0x1c4   :  { %v330_v16 = vadd.f32 %v329_v17, %v328_v15 }
 0x1c6   :  { %v331_v18 = vrot.slane %v330_v16, 1 }
 0x1c8   :  { %v332_v20 = vadd.f32 %v331_v18, %v330_v16 }
 0x1ca   :  { %360 = vpush %v332_v20 }
 0x1fb   :  { %s361_s12 = spop %360 }
 0x1fc   :  { %v334_v58 = vstv %s361_s12 }
 0x1fd   :  { %336 = vst.msk [vmem:[#allocation2] sm:$0x1] %vm335_vm9, %v334_v58 }
 0x1fe   :  { %347 = dma.vmem_to_hbm [thread:$0]  %s343_s11, 16, %s345_s9, [#allocation3]  }
 0x1ff   :  { %447 = dma.done.wait [#allocation3], 16  }
 0x200   :  { %448 = vsyncadd [#allocation3], 4294967280 }
 0x201   :  { %352 = vsyncpa [#allocation3], 1 }

</bundles_post_ra>
